<compile_context>
chip_gen: v7x
topology: tpu7x:2x2x1
jax: 0.10.0
libtpu: 0.0.40
codegen_flags: <defaults>
</compile_context>

<pallas_src>
import functools

import jax
import jax.numpy as jnp
from jax.experimental import pallas as pl
from jax.experimental.pallas import tpu as pltpu


# ---------------------------------------------------------------------------
# Kernel
# ---------------------------------------------------------------------------
def _ctc_head_kernel(x_ref, w_ref, b_ref, o_ref, *, apply_softmax, compute_dtype):
    # Fused casts: x arrives f32 (no wrapper-side cast pass over HBM); the VPU
    # cast hides under the DMA/MXU.  The weight cast is a no-op when the weight
    # was pre-cast to `compute_dtype` at init time.
    x = x_ref[...].astype(compute_dtype)
    w = w_ref[...].astype(compute_dtype)
    y = jnp.dot(x, w, preferred_element_type=jnp.float32)  # MXU, f32 accumulation
    y = y + b_ref[...]                                      # (rt, C_out) + (1, C_out)
    if apply_softmax:
        # Numerically stable softmax over the class axis (PyTorch dim=2).
        m = jnp.max(y, axis=-1, keepdims=True)
        e = jnp.exp(y - m)
        denom = jnp.sum(e, axis=-1, keepdims=True)
        y = e * pl.reciprocal(denom, approx=True)           # EUP reciprocal
    o_ref[...] = y.astype(o_ref.dtype)


# ---------------------------------------------------------------------------
# Wrapper
# ---------------------------------------------------------------------------
def _round_up(x, m):
    return ((x + m - 1) // m) * m


def _vmem_capacity_bytes():
    try:
        return int(pltpu.get_tpu_info().vmem_capacity_bytes)
    except Exception:
        return 64 * 1024 * 1024  # v7x-safe fallback


def _vmem_estimate_bytes(rt, c_in, c_out, x_bytes, w_bytes, out_bytes):
    x_bufs = 2 * rt * c_in * x_bytes        # double-buffered activation tile (f32)
    o_bufs = 2 * rt * c_out * out_bytes     # double-buffered output tile
    w_bufs = 2 * c_in * c_out * w_bytes     # resident weight (pipeline reserves 2 bufs)
    b_bufs = 2 * c_out * 4                  # resident bias
    interm = 3 * rt * c_out * 4             # f32 logits / exp / normalized product
    return x_bufs + o_bufs + w_bufs + b_bufs + interm


def prepare_ctc_head_params(weight, bias, compute_dtype=jnp.bfloat16):
    """Hoist the weight cast out of the per-call path (do once at init)."""
    return weight.astype(compute_dtype), bias.astype(jnp.float32)


def ctc_head_forward(
    x,
    weight,
    bias,
    *,
    training=False,
    row_tile=512,
    compute_dtype=jnp.bfloat16,
    out_dtype=jnp.float32,
):
    """CTCHead forward.

    Args:
      x:      (B, T, C_in) float32
      weight: (C_in, C_out) — ideally pre-cast to bf16 via prepare_ctc_head_params
      bias:   (C_out,)
      training: if False (eval), apply softmax over the class axis (dim=2).
    Returns:
      (B, T, C_out) in out_dtype (default float32, matching PyTorch).
    """
    B, T, C_in = x.shape
    C_out = weight.shape[1]
    M = B * T
    SUBLANE = 8

    x_bytes = jnp.dtype(x.dtype).itemsize
    w_bytes = jnp.dtype(weight.dtype).itemsize
    out_bytes = jnp.dtype(out_dtype).itemsize

    # Row tile: multiple of 8 sublanes; capped so the grid has >= 2 blocks (so
    # the "parallel" axis can shard across v7x's 2 TensorCores); shrunk until
    # the working set (incl. f32 softmax intermediates) fits the per-chip
    # VMEM budget.
    cap = _vmem_capacity_bytes()
    budget = (cap * 3) // 4  # ~96 MiB on v5e/v6e (128 MiB), ~48 MiB on v7x (64 MiB)
    rt = _round_up(max(min(row_tile, M), 1), SUBLANE)
    if M >= 2 * SUBLANE:
        rt = min(rt, _round_up(pl.cdiv(M, 2), SUBLANE))
    while rt > SUBLANE and _vmem_estimate_bytes(
        rt, C_in, C_out, x_bytes, w_bytes, out_bytes
    ) > budget:
        rt = _round_up(max(rt // 2, SUBLANE), SUBLANE)

    est = _vmem_estimate_bytes(rt, C_in, C_out, x_bytes, w_bytes, out_bytes)
    vmem_limit = int(min(max(2 * est, 32 << 20), int(cap * 0.9)))

    # Layout plumbing only (no HBM passes): flatten rows, bias -> (1, C_out) f32.
    x2d = x.reshape(M, C_in)
    b2d = bias.astype(jnp.float32).reshape(1, C_out)

    kernel = functools.partial(
        _ctc_head_kernel,
        apply_softmax=not training,
        compute_dtype=compute_dtype,
    )

    out2d = pl.pallas_call(
        kernel,
        out_shape=jax.ShapeDtypeStruct((M, C_out), out_dtype),
        grid_spec=pltpu.PrefetchScalarGridSpec(
            num_scalar_prefetch=0,
            grid=(pl.cdiv(M, rt),),
            in_specs=[
                pl.BlockSpec((rt, C_in), lambda i: (i, 0)),     # x row tile (f32)
                pl.BlockSpec((C_in, C_out), lambda i: (0, 0)),  # weight (resident)
                pl.BlockSpec((1, C_out), lambda i: (0, 0)),     # bias (resident)
            ],
            out_specs=pl.BlockSpec((rt, C_out), lambda i: (i, 0)),
        ),
        compiler_params=pltpu.CompilerParams(
            dimension_semantics=("parallel",),
            vmem_limit_bytes=vmem_limit,
        ),
    )(x2d, weight, b2d)

    return out2d.reshape(B, T, C_out)


def init_ctc_head_params(key, in_channels, out_channels):
    """Deterministic nn.Linear-style init: U(-1/sqrt(in), 1/sqrt(in))."""
    kw, kb = jax.random.split(key)
    bound = 1.0 / jnp.sqrt(jnp.float32(in_channels))
    weight = jax.random.uniform(
        kw, (in_channels, out_channels), jnp.float32, -bound, bound
    )
    bias = jax.random.uniform(kb, (out_channels,), jnp.float32, -bound, bound)
    return weight, bias


if __name__ == "__main__":
    # Small shapes consistent with CTCHead's forward: x is (B, T, in_channels).
    B, T, IN_CH, OUT_CH = 2, 8, 32, 64

    key = jax.random.PRNGKey(0)
    kx, kp = jax.random.split(key)
    x = jax.random.normal(kx, (B, T, IN_CH), jnp.float32)
    weight_f32, bias_f32 = init_ctc_head_params(kp, IN_CH, OUT_CH)
    # Hoist the weight cast out of the per-call path (done once at init).
    weight, bias = prepare_ctc_head_params(weight_f32, bias_f32)

    # Eval-mode forward (softmax over class axis), like PyTorch `not self.training`.
    fwd_eval = jax.jit(functools.partial(ctc_head_forward, training=False))
    out = jax.block_until_ready(fwd_eval(x, weight, bias))
    assert out.shape == (B, T, OUT_CH)

    # Reference matched to the kernel's numerics (bf16 MXU inputs, f32 accumulation).
    x_bf = x.reshape(B * T, IN_CH).astype(jnp.bfloat16)
    ref_logits = (
        jnp.dot(x_bf, weight, preferred_element_type=jnp.float32) + bias_f32
    ).reshape(B, T, OUT_CH)
    ref_soft = jax.nn.softmax(ref_logits, axis=2)
    assert jnp.allclose(out, ref_soft, atol=5e-3, rtol=5e-3), (
        float(jnp.max(jnp.abs(out - ref_soft)))
    )

    # Training-mode forward (raw logits, no softmax).
    fwd_train = jax.jit(functools.partial(ctc_head_forward, training=True))
    logits = jax.block_until_ready(fwd_train(x, weight, bias))
    assert logits.shape == (B, T, OUT_CH)
    assert jnp.allclose(logits, ref_logits, atol=5e-3, rtol=5e-3), (
        float(jnp.max(jnp.abs(logits - ref_logits)))
    )

    # f32-weight fall-back path (cast fused in-kernel) produces the same result.
    out_f32w = jax.block_until_ready(fwd_eval(x, weight_f32, bias_f32))
    assert jnp.allclose(out_f32w, ref_soft, atol=5e-3, rtol=5e-3)

    print("KERNEL_OK")
</pallas_src>

<mosaic_0001>
module attributes {stable_mosaic.version = 11 : i64} {
  func.func @_ctc_head_kernel(%arg0: i32, %arg1: memref<8x32xf32, #tpu.memory_space<vmem>>, %arg2: memref<32x64xbf16, #tpu.memory_space<vmem>>, %arg3: memref<1x64xf32, #tpu.memory_space<vmem>>, %arg4: memref<8x64xf32, #tpu.memory_space<vmem>>) attributes {dimension_semantics = [#tpu.dimension_semantics<parallel>], iteration_bounds = array<i64: 2>, scalar_prefetch = 0 : i64, scratch_operands = 0 : i64, tpu.core_type = #tpu.core_type<tc>, window_params = [{transform_indices = @transform_0, window_bounds = array<i64: 8, 32>}, {pipeline_mode = #tpu.pipeline_mode<synchronous>, transform_indices = @transform_1, window_bounds = array<i64: 32, 64>}, {pipeline_mode = #tpu.pipeline_mode<synchronous>, transform_indices = @transform_2, window_bounds = array<i64: 1, 64>}, {transform_indices = @transform_3, window_bounds = array<i64: 8, 64>}]} {
    %c0 = arith.constant 0 : index
    %c0_0 = arith.constant 0 : index
    %0 = vector.load %arg1[%c0, %c0_0] : memref<8x32xf32, #tpu.memory_space<vmem>>, vector<8x32xf32>
    %1 = arith.truncf %0 : vector<8x32xf32> to vector<8x32xbf16>
    %c0_1 = arith.constant 0 : index
    %c0_2 = arith.constant 0 : index
    %2 = vector.load %arg2[%c0_1, %c0_2] : memref<32x64xbf16, #tpu.memory_space<vmem>>, vector<32x64xbf16>
    %cst = arith.constant dense<0.000000e+00> : vector<8x64xf32>
    %3 = tpu.matmul %1, %2, %cst {dimension_numbers = #tpu.dot_dimension_numbers<[1], [0], [0], [1], [0, 0, 1, 1], [], []>} : vector<8x32xbf16>, vector<32x64xbf16>, vector<8x64xf32> -> vector<8x64xf32>
    %c0_3 = arith.constant 0 : index
    %c0_4 = arith.constant 0 : index
    %4 = vector.load %arg3[%c0_3, %c0_4] : memref<1x64xf32, #tpu.memory_space<vmem>>, vector<1x64xf32>
    %5 = vector.broadcast %4 : vector<1x64xf32> to vector<8x64xf32>
    %6 = arith.addf %3, %5 : vector<8x64xf32>
    %cst_5 = arith.constant dense<0xFF800000> : vector<8xf32>
    %7 = vector.multi_reduction <maximumf>, %6, %cst_5 [1] : vector<8x64xf32> to vector<8xf32>
    %8 = vector.shape_cast %7 : vector<8xf32> to vector<8x1xf32>
    %9 = vector.broadcast %8 : vector<8x1xf32> to vector<8x64xf32>
    %10 = arith.subf %6, %9 : vector<8x64xf32>
    %11 = math.exp %10 : vector<8x64xf32>
    %cst_6 = arith.constant dense<0.000000e+00> : vector<8xf32>
    %12 = vector.multi_reduction <add>, %11, %cst_6 [1] : vector<8x64xf32> to vector<8xf32>
    %13 = vector.shape_cast %12 : vector<8xf32> to vector<8x1xf32>
    %14 = tpu.reciprocal %13 {approx = true} : vector<8x1xf32> -> vector<8x1xf32>
    %15 = vector.broadcast %14 : vector<8x1xf32> to vector<8x64xf32>
    %16 = arith.mulf %11, %15 : vector<8x64xf32>
    %c0_7 = arith.constant 0 : index
    %c0_8 = arith.constant 0 : index
    %17 = vector.load %arg4[%c0_7, %c0_8] : memref<8x64xf32, #tpu.memory_space<vmem>>, vector<8x64xf32>
    tpu.vector_store %arg4[%c0_7, %c0_8], %16 {strides = array<i32>} : memref<8x64xf32, #tpu.memory_space<vmem>>, vector<8x64xf32>,
    return
  }
  func.func @transform_0(%arg0: i32) -> (i32, i32) {
    %c0_i32 = arith.constant 0 : i32
    %c0_i32_0 = arith.constant 0 : i32
    return %arg0, %c0_i32 : i32, i32
  }
  func.func @transform_1(%arg0: i32) -> (i32, i32) {
    %c0_i32 = arith.constant 0 : i32
    %c0_i32_0 = arith.constant 0 : i32
    %c0_i32_1 = arith.constant 0 : i32
    return %c0_i32, %c0_i32_0 : i32, i32
  }
  func.func @transform_2(%arg0: i32) -> (i32, i32) {
    %c0_i32 = arith.constant 0 : i32
    %c0_i32_0 = arith.constant 0 : i32
    %c0_i32_1 = arith.constant 0 : i32
    return %c0_i32, %c0_i32_0 : i32, i32
  }
  func.func @transform_3(%arg0: i32) -> (i32, i32) {
    %c0_i32 = arith.constant 0 : i32
    %c0_i32_0 = arith.constant 0 : i32
    return %arg0, %c0_i32 : i32, i32
  }
}

</mosaic_0001>

<bundles_post_ra>
// kernel: ctc_head_forward.1
= control target key start
LH: loop header
LB: loop body
LE: loop exit
PB: predicated region body
PF: predicated region fallthrough
CT: control target
= control target key end

     0   :  { %8 = vsyncpa [#allocation3], 0  ;;  %s837_s0 = inlined_call_operand.hbm [shape: f32[16,32], index: 0, kind: input, shape index: {}]   ;;  %s838_s1 = inlined_call_operand.hbm [shape: bf16[32,64], index: 1, kind: input, shape index: {}]   ;;  %s839_s2 = inlined_call_operand.vmem [shape: f32[1,64], index: 2, kind: input, shape index: {}]   ;;  %s840_s3 = inlined_call_operand.hbm [shape: f32[16,64], index: 3, kind: output, shape index: {}]  }
   0x1   :  { %10 = vsyncpa [#allocation3 + $0x1], 0 }
   0x2   :  { %11 = vsyncpa [#allocation6], 0 }
   0x3   :  { %12 = vsyncpa [#allocation4], 0 }
   0x4   :  { %14 = vsyncpa [#allocation4 + $0x1], 0  ;;  %s631_s12 = smov 0   ;;  %s633_s13 = smov 0  }
   0x5   :  { %s635_s14 = smov 0   ;;  %s637_s15 = smov 0  }
   0x6 LB: > { %s652_s16 = sadd.s32 4294967295, %s602_s15   ;;  %s378_s17 = sadd.s32 4294967294, %s602_s15   ;;  %s602_s15 = sphi %s637_s15, %s860_s15   ;;  %s598_s14 = sphi %s635_s14, %s859_s14   ;;  %s594_s13 = sphi %s633_s13, %s858_s13   ;;  %s590_s12 = sphi %s631_s12, %s857_s12  }
   0x7   : > { %p40_p0 = scmp.ne.s32.totalorder %s594_s13, %s590_s12  ;;  %p841_p1 = scmp.eq.s32.totalorder %s652_s16, 0 }
   0x8   : > { %p112_p3 = scmp.eq.s32.totalorder %s378_s17, 1  ;;  %p379_p5 = scmp.ge.s32.totalorder %s602_s15, 1 }
   0x9   : > { %p661_p4 = por %p841_p1, %p40_p0  ;;  %p119_p7 = scmp.lt.s32.totalorder %s602_s15, 3 }
   0xa   : > { %p666_p6 = por %p112_p3, %p40_p0  ;;  %s604_s21 = smov [#allocation5]  }
   0xb   : > { %s844_s18 = scalar_select %p661_p4, 1, 0 }
   0xc   : > { %s845_s19 = scalar_select %p666_p6, 1, 0 }
   0xd   : > { %p671_p8 = pnand %p379_p5, %p119_p7  ;;  %s131_s22 = sshll.u32 %s604_s21, 4  ;;  %s675_s22 = int_to_ptr.vmem [resolvable:$true] %s131_s22 }
   0xe   : > { %s687_s24 = sadd.s32 1, %s602_s15   ;;  %s27_s25 = sadd.s32 1, %s598_s14 }
   0xf   : > { %s846_s20 = scalar_select %p671_p8, 1, 0 }
  0x10   : > { %p415_p9 = pneg %p671_p8  ;;  %s24_s26 = ssub.s32 %s602_s15, %s687_s24 }
  0x11   : > { %s474_s29 = scalar_lea.hbm %s838_s1, 256 }
  0x12   : > { %p682_p11 = pnand %p415_p9, %p841_p1  ;;  %p475_p12 = scmp.ne.s32.totalorder %s838_s1, %s474_s29 }
  0x13   : > { %p481_p5 = scmp.lt.u32.totalorder %s474_s29, %s838_s1 }
  0x14   : > { %p476_p13 = pneg %p682_p11 }
  0x16   : > { %p477_p0 = pnand %p476_p13, %p475_p12 }
  0x18   : > { %p478_p3 = pneg %p477_p0 }
  0x1a   : > { %p483_p7 = pnand %p481_p5, %p478_p3 }
  0x1c   : > { %486 = shalt.err (!%p483_p7)
}
  0x1d   : > { %s487_s7 = scalar_lea.vmem %s675_s22, 256  ;;  %p495_p2 = scmp.lt.s32.totalorder %s675_s22, %s675_s22 }
  0x1e   : > { %p488_p9 = scmp.ne.s32.totalorder %s675_s22, %s487_s7  ;;  %p496_p6 = scmp.lt.s32.totalorder %s487_s7, %s487_s7 }
  0x20   : > { %p490_p10 = pnand %p488_p9, %p476_p13  ;;  %p497_p4 = por %p496_p6, %p495_p2 }
  0x22   : > { %p491_p1 = pneg %p490_p10 }
  0x24   : > { %p498_p8 = pnand %p497_p4, %p491_p1 }
  0x26   : > { %501 = shalt.err (!%p498_p8)
}
  0x27   : > { %s605_s8 = smov 64   ;;  %s606_s9 = smov 4  }
  0x28   : > { %418 = dma.hbm_to_vmem [thread:$0]  (!%p682_p11), %s838_s1, 256, %s675_s22, [#allocation6], %s605_s8, %s605_s8, %s606_s9  }
  0x29   : > { %p25_p2 = scmp.eq.s32.totalorder %s24_s26, 0  ;;  %p34_p1 = scmp.ne.s32.totalorder %s598_s14, %s594_s13 }
  0x2a   : > { %p35_p4 = scmp.eq.s32.totalorder %s602_s15, 0  ;;  %p428_p6 = scmp.lt.s32.totalorder %s602_s15, 2 }
  0x2b   : > { %s718_s17 = scalar_select %p25_p2, %s598_s14, %s27_s25  }
  0x2c   : > { %p36_p8 = por %p35_p4, %p34_p1  ;;  %p848_p10 = scmp.eq.s32.totalorder %s652_s16, 1 }
  0x2d   : > { %s148_s27 = sand.u32 1, %s598_s14   ;;  %s383_s28 = sshll.u32 %s602_s15, 7 }
  0x2e   : > { %p722_p12 = por %p848_p10, %p34_p1  ;;  %s382_s29 = sshll.u32 %s148_s27, 3 }
  0x2f   : > { %s731_s4 = scalar_lea.hbm %s837_s0, %s383_s28  ;;  %s152_s22 = scalar_lea.vmem [#allocation2], %s382_s29 }
  0x30   : > { %s159_s25 = sshll.u32 %s152_s22, 4  ;;  %p733_p11 = pnand %p428_p6, %p36_p8  ;;  %s737_s25 = int_to_ptr.vmem [resolvable:$true] %s159_s25 }
  0x31   : > { %s149_s5 = scalar_lea.sflag [#allocation3], %s148_s27  ;;  %s502_s6 = scalar_lea.hbm %s731_s4, 128 }
  0x32   : > { %p503_p13 = scmp.ne.s32.totalorder %s731_s4, %s502_s6  ;;  %p504_p0 = pneg %p733_p11 }
  0x33   : > { %s507_s9 = scalar_lea.hbm %s837_s0, 256  ;;  %p508_p7 = scmp.lt.u32.totalorder %s731_s4, %s837_s0 }
  0x34   : > { %p505_p3 = pnand %p504_p0, %p503_p13  ;;  %p509_p9 = scmp.lt.u32.totalorder %s507_s9, %s502_s6 }
  0x35   : > { %p511_p1 = scmp.lt.u32.totalorder %s502_s6, %s731_s4 }
  0x36   : > { %p506_p5 = pneg %p505_p3  ;;  %p510_p2 = por %p509_p9, %p508_p7 }
  0x38   : > { %p512_p4 = por %p511_p1, %p510_p2 }
  0x3a   : > { %p513_p6 = pnand %p512_p4, %p506_p5 }
  0x3c   : > { %516 = shalt.err (!%p513_p6)
}
  0x3d   : > { %s517_s27 = scalar_lea.vmem %s737_s25, 128  ;;  %s607_s28 = smov [#allocation2]  }
  0x3e   : > { %p518_p8 = scmp.ne.s32.totalorder %s737_s25, %s517_s27  ;;  %s522_s29 = sshll.u32 %s607_s28, 4  ;;  %s523_s29 = int_to_ptr.vmem [resolvable:$false] %s522_s29 }
  0x3f   : > { %s524_s23 = scalar_lea.vmem %s523_s29, 256  ;;  %p525_p3 = scmp.lt.s32.totalorder %s737_s25, %s523_s29 }
  0x40   : > { %p520_p10 = pnand %p518_p8, %p504_p0  ;;  %p526_p7 = scmp.lt.s32.totalorder %s524_s23, %s517_s27 }
  0x42   : > { %p521_p13 = pneg %p520_p10  ;;  %p527_p9 = por %p526_p7, %p525_p3 }
  0x44   : > { %p528_p2 = pnand %p527_p9, %p521_p13 }
  0x46   : > { %531 = shalt.err (!%p528_p2)
}
  0x47   : > { %422 = dma.hbm_to_vmem [thread:$0]  (!%p733_p11), %s731_s4, 128, %s737_s25, %s149_s5  }
  0x48   : > { %p851_p5 = scmp.ne.s32.totalorder %s846_s20, 0 }
  0x49   : > { %s767_s30 = sand.u32 (!%p851_p5), 1, %s594_s13   ;;  %p852_p0 = scmp.ne.s32.totalorder (!%p851_p5), %s844_s18, 0 }
  0x4a   : > { %168 = sbr.rel (%p851_p5) target bundleno = 636 (0x27c), region = 32  ;;  %s385_s22 = sshll.u32 (!%p851_p5), %s767_s30, 3 }
  0x4b   : > { %s171_s6 = scalar_lea.sflag (!%p851_p5), [#allocation3], %s767_s30  ;;  %s174_s7 = scalar_lea.vmem (!%p851_p5), [#allocation2], %s385_s22 }
  0x51   : > { %577 = dma.done.wait (%p852_p0), %s171_s6, 128  }
  0x52   : > { %579 = vsyncadd (%p852_p0), %s171_s6, 4294967168  ;;  %p853_p11 = scmp.eq.s32.totalorder %s652_s16, 0 }
  0x54   : > { %581 = dma.done.wait (%p853_p11), [#allocation6], 256   ;;  %p854_p1 = pmov %p853_p11 }
  0x55   : > { %v608_v0 = vmov 0.0   ;;  %vm609_vm0 = vmmov 0   ;;  %v468_v1 = vld [vmem:[#allocation5] sm:$0xff]   ;;  %v469_v2 = vld [vmem:[#allocation5 + $0x8] sm:$0xff]   ;;  %v202_v3 = vld [vmem:[%s174_s7] sm:$0xff]  ;;  %vm227_vm1 = vcmask 261120  }
  0x56   : > { %583 = vsyncadd (%p854_p1), [#allocation6], 4294967040  ;;  %399 = vmatprep.subr.bf16.mxu0 %v608_v0  ;;  %403 = vmatprep.mubr.msk.bf16.mxu0 %vm609_vm0, %v608_v0  ;;  %v203_v4 = vpack.c.bf16 %v202_v3, %v202_v3  ;;  %v388_v5 = vld [vmem:[%s839_s2] ss:$0 sm:$0xff]  ;;  %vm271_vm2 = vcmask 523264   ;;  %s393_s4 = sshll.u32 %s652_s16, 7 }
  0x57   : > { %400 = vmatpush3.bf16.msra.mxu0 %v468_v1  ;;  %s200_s25 = scalar_lea.vmem [#allocation7], %s385_s22  ;;  %s792_s9 = scalar_lea.hbm %s840_s3, %s393_s4 }
  0x58   : > { %401 = vmatprep.subr.bf16.mxu0 %v608_v0  ;;  %s298_s26 = sshll.u32 %s200_s25, 4  ;;  %s285_s10 = scalar_lea.sflag [#allocation4], %s767_s30  ;;  %s794_s26 = int_to_ptr.vmem [resolvable:$true] %s298_s26 }
  0x59   : > { %s532_s11 = scalar_lea.vmem %s794_s26, 128  ;;  %s610_s16 = smov [#allocation7]  }
  0x5a   : > { %p533_p4 = scmp.ne.s32.totalorder %s794_s26, %s532_s11  ;;  %s536_s27 = sshll.u32 %s610_s16, 4  ;;  %s537_s27 = int_to_ptr.vmem [resolvable:$false] %s536_s27 }
  0x5b   : > { %402 = vmatpush3.bf16.msra.mxu0 %v469_v2  ;;  %s538_s28 = scalar_lea.vmem %s537_s27, 256  ;;  %p539_p10 = scmp.lt.s32.totalorder %s794_s26, %s537_s27 }
  0x5c   : > { %p534_p6 = pnand %p533_p4, %p722_p12  ;;  %p540_p13 = scmp.lt.s32.totalorder %s538_s28, %s532_s11 }
  0x5e   : > { %404 = vmatmul.mubr.msk.bf16.vlgmr.msra.gmra.mrb[0].mxu0 %vm227_vm1, %v203_v4  ;;  %p535_p8 = pneg %p534_p6  ;;  %p541_p3 = por %p540_p13, %p539_p10 }
  0x60   : > { %p542_p7 = pnand %p541_p3, %p535_p8 }
 0x131   : > { %v265_v6 = vpop.f32.mrb[0].mxu0 }
 0x132   : > { %v266_v7 = vadd.f32 %v388_v5, %v265_v6  ;;  %v405_v8 = vpop.f32.mrb[1].mxu0 }
 0x133   : > { %v268_v9 = vpop.f32.mrb[2].mxu0 }
 0x134   : > { %v406_v10 = vpop.f32.mrb[3].mxu0  ;;  %v272_v11 = vsel %vm271_vm2, %v266_v7, -inf }
 0x135   : > { %273 = vmax.xlane.f32.xlu0 %v272_v11 }
 0x1c2   : > { %v274_v12 = vpop.xlane.xlu0 %273 }
 0x1c3   : > { %v275_v13 = vsub.f32 %v266_v7, %v274_v12 }
 0x1c5   : > { %v276_v14 = vmul.f32 1.442695, %v275_v13 }
 0x1c7   : > { %470 = vpow2.f32 %v276_v14 }
 0x1d1   : > { %v471_v15 = vpop.eup %470 }
 0x1d2   : > { %v278_v16 = vsel %vm271_vm2, %v471_v15, 0.0 }
 0x1d3   : > { %279 = vadd.xlane.f32.xlu0 %v278_v16 }
 0x260   : > { %v280_v17 = vpop.xlane.xlu0 %279 }
 0x261   : > { %472 = vrcp.f32 %v280_v17 }
 0x26b   : > { %v473_v18 = vpop.eup %472 }
 0x26c   : > { %v282_v19 = vmul.f32 %v473_v18, %v471_v15 }
 0x26e   : > { %283 = vst.msk [vmem:[%s200_s25] sm:$0xff] %vm271_vm2, %v282_v19 }
 0x26f   : > { %545 = shalt.err (!%p542_p7)
}
 0x270   : > { %s546_s29 = scalar_lea.hbm %s792_s9, 128  ;;  %s550_s22 = scalar_lea.hbm %s840_s3, 256 }
 0x271   : > { %p547_p9 = scmp.ne.s32.totalorder %s792_s9, %s546_s29  ;;  %p551_p0 = scmp.lt.u32.totalorder %s792_s9, %s840_s3 }
 0x272   : > { %p552_p11 = scmp.lt.u32.totalorder %s550_s22, %s546_s29  ;;  %p554_p4 = scmp.lt.u32.totalorder %s546_s29, %s792_s9 }
 0x273   : > { %p548_p2 = pnand %p547_p9, %p722_p12 }
 0x274   : > { %p553_p1 = por %p552_p11, %p551_p0 }
 0x275   : > { %p549_p5 = pneg %p548_p2 }
 0x276   : > { %p555_p6 = por %p554_p4, %p553_p1 }
 0x278   : > { %p556_p8 = pnand %p555_p6, %p549_p5 }
 0x27a   : > { %559 = shalt.err (!%p556_p8)
}
 0x27b   : > { %413 = dma.vmem_to_hbm [thread:$0]  (%p722_p12), %s794_s26, 128, %s792_s9, %s285_s10  }
 0x27c PF: > { %s310_s18 = sand.u32 1, %s590_s12   ;;  %p855_p10 = scmp.ne.s32.totalorder %s845_s19, 0 }
 0x27d   : > { %p856_p13 = scmp.ge.s32.totalorder %s602_s15, 2  ;;  %s311_s20 = scalar_lea.sflag [#allocation4], %s310_s18 }
 0x27f   : > { %p424_p3 = pnand %p856_p13, %p855_p10 }
 0x281   : > { %585 = dma.done.wait (!%p424_p3), %s311_s20, 128  }
 0x282   : > { %587 = vsyncadd (!%p424_p3), %s311_s20, 4294967168  ;;  %p17_p7 = scmp.ge.s32.totalorder %s687_s24, 4   ;;  %s857_s12 = smov %s594_s13 }
 0x283   : > { %s858_s13 = smov %s598_s14  ;;  %s859_s14 = smov %s718_s17 }
 0x284   : > { %s860_s15 = smov %s687_s24  ;;  %19 = sbr.rel (!%p17_p7) target bundleno = 6 (0x6), region = 81 }
 0x28b   :  { %316 = vsyncpa [#allocation3], 1 }
 0x28c   :  { %318 = vsyncpa [#allocation3 + $0x1], 1 }
 0x28d   :  { %319 = vsyncpa [#allocation6], 1 }
 0x28e   :  { %320 = vsyncpa [#allocation4], 1 }
 0x28f   :  { %322 = vsyncpa [#allocation4 + $0x1], 1 }

</bundles_post_ra>
